<compile_context>
chip_gen: v5e
topology: v5e:2x2
jax: 0.10.0
libtpu: 0.0.40
codegen_flags: <defaults>
</compile_context>

<pallas_src>
import functools

import jax
import jax.numpy as jnp
from jax.experimental import pallas as pl
from jax.experimental.pallas import tpu as pltpu


def _round_up(x, m):
    return ((x + m - 1) // m) * m


def _adaptive_recall_loss_kernel(logits_ref, tgt_ref, cw_ref, out_ref, *,
                                 alpha, gamma, fp_penalty, n_valid,
                                 blocks_per_core):
    # logits_ref: (C, TN) f32 class-major tile
    # tgt_ref:    (1, TN) i32
    # cw_ref:     (C, 1)  f32
    # out_ref:    (1, 128) f32 per-core partial-sum accumulator
    core = pl.program_id(0)   # "parallel" axis (2 TCs on v7x, serial elsewhere)
    blk = pl.program_id(1)    # "arbitrary" reduction axis over batch tiles

    @pl.when(blk == 0)
    def _():
        out_ref[...] = jnp.zeros_like(out_ref)

    logits = logits_ref[...]                 # (C, TN) f32
    tgt = tgt_ref[...]                       # (1, TN) i32
    cw = cw_ref[...]                         # (C, 1)  f32
    c, tn = logits.shape

    # Mask off batch-padding columns (global sample index >= n_valid).
    col = jax.lax.broadcasted_iota(jnp.int32, (1, tn), 1)
    global_col = (core * blocks_per_core + blk) * tn + col
    valid = global_col < n_valid             # (1, TN) bool

    # One-hot over the class (sublane) axis via implicit broadcast.
    cls = jax.lax.broadcasted_iota(jnp.int32, (c, tn), 0)
    one_hot = cls == tgt                     # (C, TN) bool

    # Softmax pieces along the class axis.
    col_max = jnp.max(logits, axis=0, keepdims=True)    # (1, TN)
    exps = jnp.exp(logits - col_max)                     # (C, TN)
    sumexp = jnp.sum(exps, axis=0, keepdims=True)        # (1, TN)
    log_sumexp = jnp.log(sumexp)                         # (1, TN)

    # Fused one-hot gathers (no log_prob materialized):
    #   logp_t = logits_t - col_max - log_sumexp
    #   ce     = -w_t * logp_t = w_t*(col_max + log_sumexp) - w_t*logits_t
    wlogit_t = jnp.sum(jnp.where(one_hot, cw * logits, 0.0),
                       axis=0, keepdims=True)            # (1, TN) = w_t*logits_t
    w_t = jnp.sum(jnp.where(one_hot, cw, 0.0),
                  axis=0, keepdims=True)                 # (1, TN)
    ce = w_t * (col_max + log_sumexp) - wlogit_t         # (1, TN)

    # Focal / recall terms (per-sample, lane-dense).
    pt = jnp.exp(-ce)
    one_m_pt = 1.0 - pt
    if float(gamma) == 2.0:
        focal_w = one_m_pt * one_m_pt        # fast path: no vector pow
    else:
        focal_w = one_m_pt ** gamma
    focal = focal_w * ce
    recall = (alpha + (1.0 - alpha) * pt) * focal        # (1, TN)

    # False-positive penalty on class 0.  Class 0 is row 0 in this layout and
    # ">= col_max" matches torch.argmax's first-index tie rule only because
    # the penalized class is the first row (brittle if that ever changes).
    probs0 = exps[0:1, :] / sumexp                       # exact divide (header)
    argmax_is_zero = logits[0:1, :] >= col_max
    fp_mask = (tgt != 0) & argmax_is_zero & valid        # (1, TN)

    recall_sum = jnp.sum(jnp.where(valid, recall, 0.0),
                         axis=1, keepdims=True)          # (1, 1)
    fp_sum = jnp.sum(jnp.where(fp_mask, probs0 * probs0, 0.0),
                     axis=1, keepdims=True)              # (1, 1)

    # Accumulate; the (1, 1) partial broadcasts across the 128 output lanes.
    out_ref[...] += recall_sum + fp_penalty * fp_sum


def adaptive_recall_loss(logits, targets, class_weights, *,
                         alpha=0.8, gamma=2.0, fp_penalty=0.5,
                         block_n=1024, num_cores=2):
    """logits (N, C) float, targets (N,) int, class_weights (C,) -> scalar."""
    n, c = logits.shape
    # Class-major, lane-dense layout (wrapper-side layout plumbing only).
    lg = jnp.transpose(logits.astype(jnp.float32))             # (C, N)
    tg = targets.astype(jnp.int32).reshape(1, n)                # (1, N)
    cw = class_weights.astype(jnp.float32).reshape(c, 1)        # (C, 1)

    block_n = _round_up(block_n, 128)
    per_core = pl.cdiv(n, num_cores)
    tn = min(block_n, _round_up(max(per_core, 1), 128))
    bpc = pl.cdiv(per_core, tn)                                 # blocks / core
    n_pad = num_cores * bpc * tn
    if n_pad != n:
        lg = jnp.pad(lg, ((0, 0), (0, n_pad - n)))
        tg = jnp.pad(tg, ((0, 0), (0, n_pad - n)))

    kernel = functools.partial(
        _adaptive_recall_loss_kernel,
        alpha=float(alpha), gamma=float(gamma), fp_penalty=float(fp_penalty),
        n_valid=n, blocks_per_core=bpc)

    out = pl.pallas_call(
        kernel,
        out_shape=jax.ShapeDtypeStruct((1, num_cores * 128), jnp.float32),
        grid_spec=pltpu.PrefetchScalarGridSpec(
            num_scalar_prefetch=0,
            grid=(num_cores, bpc),
            in_specs=[
                pl.BlockSpec((c, tn), lambda cc, ii: (0, cc * bpc + ii)),
                pl.BlockSpec((1, tn), lambda cc, ii: (0, cc * bpc + ii)),
                pl.BlockSpec((c, 1), lambda cc, ii: (0, 0)),
            ],
            out_specs=pl.BlockSpec((1, 128), lambda cc, ii: (0, cc)),
        ),
        compiler_params=pltpu.CompilerParams(
            dimension_semantics=("parallel", "arbitrary"),
            vmem_limit_bytes=32 * 1024 * 1024),
    )(lg, tg, cw)

    # Per-core partial sums live in lane 0 of each 128-lane output block.
    partials = out.reshape(num_cores, 128)[:, 0]
    # Both "/ len(targets)" terms folded into one multiply by 1/N.
    return jnp.sum(partials) * (1.0 / n)


def _reference_loss(logits, targets, class_weights,
                    alpha=0.8, gamma=2.0, fp_penalty=0.5):
    """Pure-jnp mirror of the PyTorch forward, for a sanity check."""
    n = logits.shape[0]
    logits = logits.astype(jnp.float32)
    logp = jax.nn.log_softmax(logits, axis=1)
    logp_t = logp[jnp.arange(n), targets]
    w_t = class_weights[targets]
    ce = -w_t * logp_t
    pt = jnp.exp(-ce)
    focal = (1.0 - pt) ** gamma * ce
    recall = (alpha + (1.0 - alpha) * pt) * focal
    probs = jax.nn.softmax(logits, axis=1)
    fp_mask = (targets != 0) & (jnp.argmax(logits, axis=1) == 0)
    fp_loss = fp_penalty * jnp.sum(jnp.where(fp_mask, probs[:, 0] ** 2, 0.0))
    return recall.mean() + fp_loss / n


if __name__ == "__main__":
    key = jax.random.PRNGKey(0)
    class_weights = jnp.array([1.0, 2.0, 0.5, 1.5], dtype=jnp.float32)

    # Small shape matching the module's use: batch=8, 4 classes.
    k1, k2, k3, k4 = jax.random.split(key, 4)
    logits_s = jax.random.normal(k1, (8, 4), dtype=jnp.float32) * 2.0
    targets_s = jax.random.randint(k2, (8,), 0, 4, dtype=jnp.int32)
    loss_s = jax.block_until_ready(
        adaptive_recall_loss(logits_s, targets_s, class_weights))
    ref_s = _reference_loss(logits_s, targets_s, class_weights)
    assert jnp.allclose(loss_s, ref_s, atol=1e-5, rtol=1e-4), (loss_s, ref_s)

    # Larger ragged batch: exercises the padding mask, multi-block
    # accumulation along the "arbitrary" axis, and the 2-way core split.
    logits_l = jax.random.normal(k3, (333, 4), dtype=jnp.float32) * 2.0
    targets_l = jax.random.randint(k4, (333,), 0, 4, dtype=jnp.int32)
    loss_l = jax.block_until_ready(
        adaptive_recall_loss(logits_l, targets_l, class_weights, block_n=128))
    ref_l = _reference_loss(logits_l, targets_l, class_weights)
    assert jnp.allclose(loss_l, ref_l, atol=1e-5, rtol=1e-4), (loss_l, ref_l)

    print("KERNEL_OK")
</pallas_src>

<mosaic_0001>
module attributes {stable_mosaic.version = 11 : i64} {
  func.func @_adaptive_recall_loss_kernel(%arg0: i32, %arg1: i32, %arg2: memref<4x128xf32, #tpu.memory_space<vmem>>, %arg3: memref<1x128xi32, #tpu.memory_space<vmem>>, %arg4: memref<4x1xf32, #tpu.memory_space<vmem>>, %arg5: memref<1x128xf32, #tpu.memory_space<vmem>>) attributes {dimension_semantics = [#tpu.dimension_semantics<parallel>, #tpu.dimension_semantics<arbitrary>], iteration_bounds = array<i64: 2, 1>, scalar_prefetch = 0 : i64, scratch_operands = 0 : i64, tpu.core_type = #tpu.core_type<tc>, window_params = [{transform_indices = @transform_0, window_bounds = array<i64: 4, 128>}, {transform_indices = @transform_1, window_bounds = array<i64: 1, 128>}, {pipeline_mode = #tpu.pipeline_mode<synchronous>, transform_indices = @transform_2, window_bounds = array<i64: 4, 1>}, {transform_indices = @transform_3, window_bounds = array<i64: 1, 128>}]} {
    %c0_i32 = arith.constant 0 : i32
    %0 = arith.cmpi eq, %arg1, %c0_i32 : i32
    %1 = arith.extui %0 : i1 to i32
    %c0_i32_0 = arith.constant 0 : i32
    %2 = arith.cmpi ne, %1, %c0_i32_0 : i32
    scf.if %2 {
      %cst_25 = arith.constant 0.000000e+00 : f32
      %76 = vector.broadcast %cst_25 : f32 to vector<1x128xf32>
      %c0_26 = arith.constant 0 : index
      %c0_27 = arith.constant 0 : index
      %77 = vector.load %arg5[%c0_26, %c0_27] : memref<1x128xf32, #tpu.memory_space<vmem>>, vector<1x128xf32>
      tpu.vector_store %arg5[%c0_26, %c0_27], %76 {strides = array<i32>} : memref<1x128xf32, #tpu.memory_space<vmem>>, vector<1x128xf32>,
    } else {
    }
    %c0 = arith.constant 0 : index
    %c0_1 = arith.constant 0 : index
    %3 = vector.load %arg2[%c0, %c0_1] : memref<4x128xf32, #tpu.memory_space<vmem>>, vector<4x128xf32>
    %c0_2 = arith.constant 0 : index
    %c0_3 = arith.constant 0 : index
    %4 = vector.load %arg3[%c0_2, %c0_3] : memref<1x128xi32, #tpu.memory_space<vmem>>, vector<1x128xi32>
    %c0_4 = arith.constant 0 : index
    %c0_5 = arith.constant 0 : index
    %5 = vector.load %arg4[%c0_4, %c0_5] : memref<4x1xf32, #tpu.memory_space<vmem>>, vector<4x1xf32>
    %6 = tpu.iota {dimensions = array<i32: 1>} : vector<1x128xi32>
    %c1_i32 = arith.constant 1 : i32
    %7 = arith.muli %arg0, %c1_i32 : i32
    %8 = arith.addi %7, %arg1 : i32
    %c128_i32 = arith.constant 128 : i32
    %9 = arith.muli %8, %c128_i32 : i32
    %10 = vector.broadcast %9 : i32 to vector<1x128xi32>
    %11 = arith.addi %10, %6 : vector<1x128xi32>
    %c8_i32 = arith.constant 8 : i32
    %12 = vector.broadcast %c8_i32 : i32 to vector<1x128xi32>
    %13 = arith.cmpi slt, %11, %12 : vector<1x128xi32>
    %14 = tpu.iota {dimensions = array<i32: 0>} : vector<4x128xi32>
    %15 = vector.broadcast %4 : vector<1x128xi32> to vector<4x128xi32>
    %16 = arith.cmpi eq, %14, %15 : vector<4x128xi32>
    %cst = arith.constant dense<0xFF800000> : vector<128xf32>
    %17 = vector.multi_reduction <maximumf>, %3, %cst [0] : vector<4x128xf32> to vector<128xf32>
    %18 = vector.shape_cast %17 : vector<128xf32> to vector<1x128xf32>
    %19 = vector.broadcast %18 : vector<1x128xf32> to vector<4x128xf32>
    %20 = arith.subf %3, %19 : vector<4x128xf32>
    %21 = math.exp %20 : vector<4x128xf32>
    %cst_6 = arith.constant dense<0.000000e+00> : vector<128xf32>
    %22 = vector.multi_reduction <add>, %21, %cst_6 [0] : vector<4x128xf32> to vector<128xf32>
    %23 = vector.shape_cast %22 : vector<128xf32> to vector<1x128xf32>
    %24 = math.log %23 : vector<1x128xf32>
    %25 = vector.broadcast %5 : vector<4x1xf32> to vector<4x128xf32>
    %26 = arith.mulf %25, %3 : vector<4x128xf32>
    %cst_7 = arith.constant 0.000000e+00 : f32
    %27 = vector.broadcast %cst_7 : f32 to vector<4x128xf32>
    %28 = arith.select %16, %26, %27 : vector<4x128xi1>, vector<4x128xf32>
    %cst_8 = arith.constant dense<0.000000e+00> : vector<128xf32>
    %29 = vector.multi_reduction <add>, %28, %cst_8 [0] : vector<4x128xf32> to vector<128xf32>
    %30 = vector.shape_cast %29 : vector<128xf32> to vector<1x128xf32>
    %cst_9 = arith.constant 0.000000e+00 : f32
    %31 = vector.shape_cast %5 : vector<4x1xf32> to vector<4x1xf32>
    %32 = vector.broadcast %31 : vector<4x1xf32> to vector<4x128xf32>
    %33 = vector.broadcast %cst_9 : f32 to vector<4x128xf32>
    %34 = arith.select %16, %32, %33 : vector<4x128xi1>, vector<4x128xf32>
    %cst_10 = arith.constant dense<0.000000e+00> : vector<128xf32>
    %35 = vector.multi_reduction <add>, %34, %cst_10 [0] : vector<4x128xf32> to vector<128xf32>
    %36 = vector.shape_cast %35 : vector<128xf32> to vector<1x128xf32>
    %37 = arith.addf %18, %24 : vector<1x128xf32>
    %38 = arith.mulf %36, %37 : vector<1x128xf32>
    %39 = arith.subf %38, %30 : vector<1x128xf32>
    %cst_11 = arith.constant 0.000000e+00 : f32
    %40 = vector.broadcast %cst_11 : f32 to vector<1x128xf32>
    %41 = arith.subf %40, %39 : vector<1x128xf32>
    %42 = math.exp %41 : vector<1x128xf32>
    %cst_12 = arith.constant 1.000000e+00 : f32
    %43 = vector.broadcast %cst_12 : f32 to vector<1x128xf32>
    %44 = arith.subf %43, %42 : vector<1x128xf32>
    %45 = arith.mulf %44, %44 : vector<1x128xf32>
    %46 = arith.mulf %45, %39 : vector<1x128xf32>
    %cst_13 = arith.constant 2.000000e-01 : f32
    %47 = vector.broadcast %cst_13 : f32 to vector<1x128xf32>
    %48 = arith.mulf %47, %42 : vector<1x128xf32>
    %cst_14 = arith.constant 8.000000e-01 : f32
    %49 = vector.broadcast %cst_14 : f32 to vector<1x128xf32>
    %50 = arith.addf %49, %48 : vector<1x128xf32>
    %51 = arith.mulf %50, %46 : vector<1x128xf32>
    %52 = vector.extract_strided_slice %21 {offsets = [0, 0], sizes = [1, 128], strides = [1, 1]} : vector<4x128xf32> to vector<1x128xf32>
    %53 = arith.divf %52, %23 : vector<1x128xf32>
    %54 = vector.extract_strided_slice %3 {offsets = [0, 0], sizes = [1, 128], strides = [1, 1]} : vector<4x128xf32> to vector<1x128xf32>
    %55 = arith.cmpf oge, %54, %18 : vector<1x128xf32>
    %c0_i32_15 = arith.constant 0 : i32
    %56 = vector.broadcast %c0_i32_15 : i32 to vector<1x128xi32>
    %57 = arith.cmpi ne, %4, %56 : vector<1x128xi32>
    %58 = arith.andi %57, %55 : vector<1x128xi1>
    %59 = arith.andi %58, %13 : vector<1x128xi1>
    %cst_16 = arith.constant 0.000000e+00 : f32
    %60 = vector.broadcast %cst_16 : f32 to vector<1x128xf32>
    %61 = arith.select %13, %51, %60 : vector<1x128xi1>, vector<1x128xf32>
    %cst_17 = arith.constant dense<0.000000e+00> : vector<1xf32>
    %62 = vector.multi_reduction <add>, %61, %cst_17 [1] : vector<1x128xf32> to vector<1xf32>
    %63 = vector.shape_cast %62 : vector<1xf32> to vector<1x1xf32>
    %64 = arith.mulf %53, %53 : vector<1x128xf32>
    %cst_18 = arith.constant 0.000000e+00 : f32
    %65 = vector.broadcast %cst_18 : f32 to vector<1x128xf32>
    %66 = arith.select %59, %64, %65 : vector<1x128xi1>, vector<1x128xf32>
    %cst_19 = arith.constant dense<0.000000e+00> : vector<1xf32>
    %67 = vector.multi_reduction <add>, %66, %cst_19 [1] : vector<1x128xf32> to vector<1xf32>
    %68 = vector.shape_cast %67 : vector<1xf32> to vector<1x1xf32>
    %c0_20 = arith.constant 0 : index
    %c0_21 = arith.constant 0 : index
    %69 = vector.load %arg5[%c0_20, %c0_21] : memref<1x128xf32, #tpu.memory_space<vmem>>, vector<1x128xf32>
    %cst_22 = arith.constant 5.000000e-01 : f32
    %70 = vector.broadcast %cst_22 : f32 to vector<1x1xf32>
    %71 = arith.mulf %70, %68 : vector<1x1xf32>
    %72 = arith.addf %63, %71 : vector<1x1xf32>
    %73 = vector.broadcast %72 : vector<1x1xf32> to vector<1x128xf32>
    %74 = arith.addf %69, %73 : vector<1x128xf32>
    %c0_23 = arith.constant 0 : index
    %c0_24 = arith.constant 0 : index
    %75 = vector.load %arg5[%c0_23, %c0_24] : memref<1x128xf32, #tpu.memory_space<vmem>>, vector<1x128xf32>
    tpu.vector_store %arg5[%c0_23, %c0_24], %74 {strides = array<i32>} : memref<1x128xf32, #tpu.memory_space<vmem>>, vector<1x128xf32>,
    return
  }
  func.func @transform_0(%arg0: i32, %arg1: i32) -> (i32, i32) {
    %c1_i32 = arith.constant 1 : i32
    %0 = arith.muli %arg0, %c1_i32 : i32
    %1 = arith.addi %0, %arg1 : i32
    %c0_i32 = arith.constant 0 : i32
    %c0_i32_0 = arith.constant 0 : i32
    return %c0_i32, %1 : i32, i32
  }
  func.func @transform_1(%arg0: i32, %arg1: i32) -> (i32, i32) {
    %c1_i32 = arith.constant 1 : i32
    %0 = arith.muli %arg0, %c1_i32 : i32
    %1 = arith.addi %0, %arg1 : i32
    %c0_i32 = arith.constant 0 : i32
    %c0_i32_0 = arith.constant 0 : i32
    return %c0_i32, %1 : i32, i32
  }
  func.func @transform_2(%arg0: i32, %arg1: i32) -> (i32, i32) {
    %c0_i32 = arith.constant 0 : i32
    %c0_i32_0 = arith.constant 0 : i32
    %c0_i32_1 = arith.constant 0 : i32
    return %c0_i32, %c0_i32_0 : i32, i32
  }
  func.func @transform_3(%arg0: i32, %arg1: i32) -> (i32, i32) {
    %c0_i32 = arith.constant 0 : i32
    %c0_i32_0 = arith.constant 0 : i32
    return %c0_i32, %arg0 : i32, i32
  }
}

</mosaic_0001>

<bundles_post_ra>
// kernel: tpu_custom_call.1
= control target key start
LH: loop header
LB: loop body
LE: loop exit
PB: predicated region body
PF: predicated region fallthrough
CT: control target
= control target key end

     0   :  { %8 = vsyncpa [#allocation3], 0  ;;  %s789_s0 = inlined_call_operand.hbm [shape: f32[4,256], index: 0, kind: input, shape index: {}]   ;;  %s790_s1 = inlined_call_operand.vmem [shape: s32[1,256], index: 1, kind: input, shape index: {}]   ;;  %s791_s2 = inlined_call_operand.vmem [shape: f32[4,1], index: 2, kind: input, shape index: {}]   ;;  %s792_s3 = inlined_call_operand.hbm [shape: f32[1,256], index: 3, kind: output, shape index: {}]  }
   0x1   :  { %10 = vsyncpa [#allocation3 + $0x1], 0 }
   0x2   :  { %11 = vsyncpa [#allocation4], 0 }
   0x3   :  { %13 = vsyncpa [#allocation4 + $0x1], 0  ;;  %s648_s12 = smov 0   ;;  %s650_s13 = smov 0  }
   0x4   :  { %s652_s14 = smov 0   ;;  %s654_s15 = smov 0  }
   0x5   :  { %s656_s16 = smov 0   ;;  %s658_s17 = smov 0  }
   0x6 LB: > { %s427_s18 = sadd.s32 4294967295, %s624_s17   ;;  %s428_s19 = sadd.s32 4294967294, %s624_s17   ;;  %s624_s17 = sphi %s658_s17, %s19_s17   ;;  %s620_s16 = sphi %s656_s16, %s801_s16   ;;  %s616_s15 = sphi %s654_s15, %s800_s15   ;;  %s612_s14 = sphi %s652_s14, %s799_s14   ;;  %s608_s13 = sphi %s650_s13, %s798_s13   ;;  %s604_s12 = sphi %s648_s12, %s797_s12  }
   0x7   : > { %s31_s20 = sadd.s32 1, %s620_s16  ;;  %s40_s21 = sadd.s32 1, %s612_s14 }
   0x8   : > { %p33_p0 = scmp.ge.s32.totalorder %s31_s20, 2  ;;  %p47_p1 = scmp.ne.s32.totalorder %s612_s14, %s608_s13 }
   0x9   : > { %p48_p2 = scmp.eq.s32.totalorder %s624_s17, 0  ;;  %p53_p3 = scmp.ne.s32.totalorder %s608_s13, %s604_s12 }
   0xa   : > { %s803_s20 = smov (%p33_p0, %s31_s20), 0  ;;  %p54_p5 = scmp.eq.s32.totalorder %s427_s18, 0 }
   0xb   : > { %p689_p4 = por %p48_p2, %p47_p1  ;;  %s37_s23 = ssub.s32 %s620_s16, %s803_s20 }
   0xc   : > { %p126_p6 = scmp.eq.s32.totalorder %s427_s18, 1  ;;  %p38_p7 = scmp.eq.s32.totalorder %s37_s23, 0 }
   0xd   : > { %p695_p8 = por %p54_p5, %p53_p3  ;;  %p132_p10 = scmp.eq.s32.totalorder %s428_s19, 1 }
   0xe   : > { %p699_p9 = por %p126_p6, %p47_p1  ;;  %p430_p12 = scmp.ge.s32.totalorder %s624_s17, 2 }
   0xf   : > { %s704_s26 = scalar_select %p38_p7, %s612_s14, %s40_s21  }
  0x10   : > { %p706_p11 = por %p132_p10, %p53_p3  ;;  %p450_p13 = scmp.lt.s32.totalorder %s624_s17, 2 }
  0x11   : > { %s155_s28 = sand.u32 1, %s612_s14   ;;  %s432_s30 = sshll.u32 %s620_s16, 2 }
  0x12   : > { %s431_s29 = sshll.u32 %s155_s28, 2  ;;  %s164_s6 = scalar_lea.hbm %s789_s0, %s432_s30 }
  0x13   : > { %s159_s7 = scalar_lea.vmem [#allocation2], %s431_s29  ;;  %s166_s9 = sshll.u32 %s164_s6, 4  ;;  %s167_s9 = int_to_ptr.hbm [resolvable:$true] %s166_s9 }
  0x14   : > { %s168_s8 = sshll.u32 %s159_s7, 4  ;;  %p443_p0 = pnand %p450_p13, %p689_p4  ;;  %s169_s8 = int_to_ptr.vmem [resolvable:$true] %s168_s8 }
  0x15   : > { %p433_p1 = scmp.ge.s32.totalorder %s624_s17, 1  ;;  %p181_p2 = scmp.lt.s32.totalorder %s624_s17, 3 }
  0x16   : > { %s156_s10 = scalar_lea.sflag [#allocation3], %s155_s28 }
  0x17   : > { %445 = dma.hbm_to_vmem [thread:$0]  (!%p443_p0), %s167_s9, 64, %s169_s8, %s156_s10  }
  0x18   : > { %p182_p3 = pnand %p433_p1, %p181_p2 }
  0x19   : > { %s722_s11 = sand.u32 (!%p182_p3), 1, %s608_s13  }
  0x1a   : > { %185 = sbr.rel (%p182_p3) target bundleno = 310 (0x136), region = 32  ;;  %s434_s18 = sshll.u32 (!%p182_p3), %s722_s11, 2 }
  0x1b   : > { %s188_s19 = scalar_lea.sflag (!%p182_p3), [#allocation3], %s722_s11  ;;  %s191_s21 = scalar_lea.vmem (!%p182_p3), [#allocation2], %s434_s18 }
  0x1f   : > { %595 = dma.done.wait (%p695_p8), %s188_s19, 64  }
  0x20   : > { %597 = vsyncadd (%p695_p8), %s188_s19, 4294967232  ;;  %v626_v0 = vmov 0   ;;  %v231_v1 = vld [vmem:[%s791_s2] sm:$0xf]  ;;  %vm243_vm0 = vcmask 1043456   ;;  %p220_p4 = scmp.lt.s32.totalorder %s616_s15, 1  ;;  %v232_v20 = vlaneseq  ;;  %s339_s8 = scalar_lea.hbm %s792_s3, %s616_s15 }
  0x21   : > { %502 = vset.pattern.permute.xlu0 %v626_v0  ;;  %v229_v2 = vld [vmem:[%s191_s21] sm:$0xf]  ;;  %s435_s28 = sshll.u32 %s616_s15, 7  ;;  %vm321_vm11 = vcmask 1040384   ;;  %s217_s5 = scalar_lea.vmem [#allocation5], %s722_s11 }
  0x22   : > { %265 = vperm.xlu0 %502, %v231_v1   ;;  %v244_v3 = vsel %vm243_vm0, %v229_v2, -inf  ;;  %s221_s24 = scalar_select %p220_p4, %s616_s15, 1  ;;  %v233_v22 = vand.u32 127, %v232_v20  ;;  %v236_v24 = vstv %s435_s28  ;;  %v240_v32 = vshrl.u32 %v232_v20, 7 }
  0x23   : > { %v245_v4 = vrot.slane %v244_v3, 4  ;;  %s341_s9 = sshll.u32 %s217_s5, 4  ;;  %s343_s10 = sshll.u32 %s339_s8, 4  ;;  %s342_s9 = int_to_ptr.vmem [resolvable:$true] %s341_s9  ;;  %s344_s10 = int_to_ptr.hbm [resolvable:$true] %s343_s10 }
  0x24   : > { %s222_s4 = scalar_lea.vmem %s790_s1, %s221_s24  ;;  %v237_v29 = vadd.s32 %v236_v24, %v233_v22  ;;  %s331_s18 = scalar_lea.sflag [#allocation4], %s722_s11 }
  0x25   : > { %v246_v5 = vmax.f32 %v244_v3, %v245_v4  ;;  %v230_v26 = vld [vmem:[%s222_s4] sm:$0x1]  ;;  %s556_s19 = sshra.s32 %s344_s10, 4  ;;  %s562_s15 = scalar_lea.hbm %s792_s3, 2  ;;  %s557_s19 = int_to_ptr.hbm [resolvable:$true] %s556_s19 }
  0x26   : > { %vm313_vm5 = vcmp.ne.s32.totalorder %v230_v26, 0  ;;  %v503_v33 = vld [vmem:[%s222_s4] ss:$0 sm:$0xff]  ;;  %vm238_vm7 = vcmp.lt.s32.totalorder %v237_v29, 8  ;;  %s558_s21 = scalar_lea.hbm %s557_s19, 1  ;;  %p563_p8 = scmp.lt.s32.totalorder %s557_s19, %s792_s3 }
  0x27   : > { %v247_v6 = vrot.slane %v246_v5, 2  ;;  %vm242_vm9 = vcmp.eq.s32.totalorder %v240_v32, %v503_v33  ;;  %p559_p5 = scmp.ne.s32.totalorder %s557_s19, %s558_s21  ;;  %p564_p10 = scmp.lt.s32.totalorder %s562_s15, %s558_s21 }
  0x29   : > { %v248_v7 = vmax.f32 %v246_v5, %v247_v6  ;;  %p560_p6 = pnand %p559_p5, %p699_p9  ;;  %p565_p13 = por %p564_p10, %p563_p8 }
  0x2b   : > { %v249_v8 = vrot.slane %v248_v7, 1  ;;  %p561_p7 = pneg %p560_p6 }
  0x2d   : > { %v734_v9 = vmax.f32 %v248_v7, %v249_v8  ;;  %p566_p0 = pnand %p565_p13, %p561_p7 }
  0x2f   : > { %v251_v10 = vsub.f32 %v229_v2, %v734_v9  ;;  %vm312_vm4 = vcmp.ge.f32.partialorder %v229_v2, %v734_v9 }
  0x30   : > { %vm314_vm8 = vmand %vm313_vm5, %vm312_vm4 }
  0x31   : > { %v252_v11 = vmul.f32 1.442695, %v251_v10  ;;  %vm315_vm10 = vmand %vm314_vm8, %vm238_vm7 }
  0x33   : > { %504 = vpow2.f32 %v252_v11 }
  0x39   : > { %v505_v12 = vpop.eup %504 }
  0x3a   : > { %v254_v13 = vsel %vm243_vm0, %v505_v12, 0.0 }
  0x3b   : > { %v255_v14 = vrot.slane %v254_v13, 4 }
  0x3d   : > { %v256_v15 = vadd.f32 %v255_v14, %v254_v13 }
  0x3f   : > { %v257_v16 = vrot.slane %v256_v15, 2 }
  0x41   : > { %v258_v17 = vadd.f32 %v257_v16, %v256_v15 }
  0x43   : > { %v259_v18 = vrot.slane %v258_v17, 1 }
  0x45   : > { %v260_v19 = vadd.f32 %v259_v18, %v258_v17 }
  0x47   : > { %506 = vrcp.f32 %v260_v19  ;;  %v308_v25 = vand.u32 2147483648, %v260_v19  ;;  %vm302_vm1 = vweird.f32 %v260_v19  ;;  %v306_v28 = vand.u32 2147483647, %v260_v19 }
  0x48   : > { %508 = vlog2.f32 %v260_v19 }
  0x49   : > { %v309_v31 = vor.u32 1.1754944e-38, %v308_v25  ;;  %vm307_vm6 = vcmp.eq.f32.partialorder %v306_v28, 8.507059e+37 }
  0x4d   : > { %v507_v21 = vpop.eup %506 }
  0x4e   : > { %v298_v23 = vmul.f32 %v507_v21, %v260_v19  ;;  %vm303_vm2 = vweird.f32 %v507_v21  ;;  %v509_v47 = vpop.eup %508 }
  0x4f   : > { %vm304_vm3 = vmor %vm302_vm1, %vm303_vm2  ;;  %v262_v53 = vmul.f32 0.6931472, %v509_v47 }
  0x50   : > { %v299_v27 = vsub.f32 1.0, %v298_v23 }
  0x51   : > { %v285_v58 = vadd.f32 %v262_v53, %v734_v9  ;;  %v627_v9 = vmov 0.0  }
  0x52   : > { %v300_v30 = vmul.f32 %v507_v21, %v299_v27  ;;  %228 = vst [vmem:[%s217_s5] sm:$0x1] %v627_v9 }
  0x54   : > { %v301_v34 = vadd.f32 %v507_v21, %v300_v30 }
  0x56   : > { %v305_v35 = vsel %vm304_vm3, %v507_v21, %v301_v34 }
  0x57   : > { %v310_v36 = vsel %vm307_vm6, %v309_v31, %v305_v35 }
  0x58   : > { %v311_v37 = vmul.f32 %v505_v12, %v310_v36 }
  0x59   : > { %v325_v14 = vld [vmem:[%s217_s5] sm:$0x1] }
  0x5a   : > { %v319_v39 = vmul.f32 %v311_v37, %v311_v37 }
  0x5c   : > { %v320_v43 = vsel %vm315_vm10, %v319_v39, 0.0 }
  0x5d   : > { %v322_v46 = vsel %vm321_vm11, %v320_v43, 0.0 }
  0x5e   : > { %323 = vadd.xlane.f32.xlu0 %v322_v46 }
  0x94   : > { %v266_v38 = vpop.permute.xlu0 %265 }
  0x95   : > { %v268_v40 = vmul.f32 %v266_v38, %v229_v2  ;;  %v277_v41 = vsel %vm242_vm9, %v266_v38, 0.0 }
  0x96   : > { %v278_v42 = vsel %vm243_vm0, %v277_v41, 0.0 }
  0x97   : > { %v269_v44 = vsel %vm242_vm9, %v268_v40, 0.0  ;;  %v279_v45 = vrot.slane %v278_v42, 4 }
  0x98   : > { %v270_v48 = vsel %vm243_vm0, %v269_v44, 0.0 }
  0x99   : > { %v271_v49 = vrot.slane %v270_v48, 4  ;;  %v280_v50 = vadd.f32 %v279_v45, %v278_v42 }
  0x9b   : > { %v272_v51 = vadd.f32 %v271_v49, %v270_v48  ;;  %v281_v52 = vrot.slane %v280_v50, 2 }
  0x9d   : > { %v273_v54 = vrot.slane %v272_v51, 2  ;;  %v282_v55 = vadd.f32 %v281_v52, %v280_v50 }
  0x9f   : > { %v274_v56 = vadd.f32 %v273_v54, %v272_v51  ;;  %v283_v57 = vrot.slane %v282_v55, 1 }
  0xa1   : > { %v284_v59 = vadd.f32 %v283_v57, %v282_v55  ;;  %v275_v60 = vrot.slane %v274_v56, 1 }
  0xa3   : > { %v276_v61 = vadd.f32 %v275_v60, %v274_v56  ;;  %v286_v62 = vmul.f32 %v285_v58, %v284_v59 }
  0xa5   : > { %v287_v63 = vsub.f32 %v286_v62, %v276_v61 }
  0xa7   : > { %v288_v0 = vsub.f32 0.0, %v287_v63 }
  0xa9   : > { %v289_v1 = vmul.f32 1.442695, %v288_v0 }
  0xab   : > { %510 = vpow2.f32 %v289_v1 }
  0xb1   : > { %v511_v2 = vpop.eup %510 }
  0xb2   : > { %v291_v3 = vsub.f32 1.0, %v511_v2  ;;  %v294_v4 = vmul.f32 0.2, %v511_v2 }
  0xb4   : > { %v292_v5 = vmul.f32 %v291_v3, %v291_v3  ;;  %v295_v7 = vadd.f32 0.8, %v294_v4 }
  0xb6   : > { %v293_v6 = vmul.f32 %v292_v5, %v287_v63 }
  0xb8   : > { %v296_v8 = vmul.f32 %v295_v7, %v293_v6 }
  0xba   : > { %v316_v10 = vsel %vm238_vm7, %v296_v8, 0.0 }
  0xbb   : > { %317 = vadd.xlane.f32.xlu1 %v316_v10 }
  0xd1   : > { %v324_v11 = vpop.xlane.xlu0 %323 }
  0xd2   : > { %v326_v12 = vmul.f32 0.5, %v324_v11 }
 0x12e   : > { %v318_v13 = vpop.xlane.xlu1 %317 }
 0x12f   : > { %v327_v15 = vadd.f32 %v326_v12, %v318_v13 }
 0x131   : > { %v328_v16 = vadd.f32 %v327_v15, %v325_v14 }
 0x133   : > { %329 = vst [vmem:[%s217_s5] sm:$0x1] %v328_v16 }
 0x134   : > { %569 = shalt.err (!%p566_p0)
}
 0x135   : > { %440 = dma.vmem_to_hbm [thread:$0]  (%p699_p9), %s342_s9, 16, %s344_s10, %s331_s18  }
 0x136 PF: > { %s355_s11 = sand.u32 1, %s604_s12   ;;  %p447_p1 = pnand %p430_p12, %p706_p11 }
 0x137   : > { %s356_s29 = scalar_lea.sflag [#allocation4], %s355_s11 }
 0x138   : > { %p448_p2 = pneg %p447_p1 }
 0x13a   : > { %599 = dma.done.wait (%p448_p2), %s356_s29, 16  }
 0x13b   : > { %601 = vsyncadd (%p448_p2), %s356_s29, 4294967280  ;;  %s19_s17 = sadd.s32 1, %s624_s17   ;;  %s797_s12 = smov %s608_s13 }
 0x13c   : > { %p16_p3 = scmp.ge.s32.totalorder %s19_s17, 4   ;;  %s798_s13 = smov %s612_s14 }
 0x13d   : > { %s799_s14 = smov %s704_s26  ;;  %s800_s15 = smov %s620_s16 }
 0x13e   : > { %s801_s16 = smov %s803_s20  ;;  %18 = sbr.rel (!%p16_p3) target bundleno = 6 (0x6), region = 84 }
 0x143   :  { %361 = vsyncpa [#allocation3], 1 }
 0x144   :  { %363 = vsyncpa [#allocation3 + $0x1], 1 }
 0x145   :  { %364 = vsyncpa [#allocation4], 1 }
 0x146   :  { %366 = vsyncpa [#allocation4 + $0x1], 1 }

</bundles_post_ra>
